<compile_context>
chip_gen: v5e
topology: v5e:2x2
jax: 0.10.0
libtpu: 0.0.40
codegen_flags: <defaults>
</compile_context>

<pallas_src>
import functools

import jax
import jax.numpy as jnp
from jax.experimental import pallas as pl
from jax.experimental.pallas import tpu as pltpu

STATE_SPACE_SIZE = 8
HIDDEN_SPACE_SIZE = 24
_LANE = 128
_MAX_TILE = 1024          # vreg-pressure cap for f32 (24, TB) intermediates

# Parameter-slab row layout (f32, lane-padded to 128 columns):
#   rows  0:24 , cols 0:8   -> W1  (24, 8)    (PyTorch nn.Linear layout: (out, in))
#   rows 24:48 , cols 0:24  -> W2  (24, 24)
#   rows 48:72 , col 0      -> w3  column (24,)
#   rows 48:72 , col 1      -> b1  column (24,)
#   rows 48:72 , col 2      -> b2  column (24,)
#   row  48    , col 3      -> b3  scalar
_SLAB_ROWS = 3 * HIDDEN_SPACE_SIZE  # 72 (multiple of 8 sublanes)


def _cdiv(a, b):
    return -(-a // b)


def _round_up(a, m):
    return _cdiv(a, m) * m


def vfa_kernel(x_ref, p_ref, o_ref):
    H, S = HIDDEN_SPACE_SIZE, STATE_SPACE_SIZE

    xt = x_ref[...]                                  # (STATE, TB), batch on lanes

    # Recover parameters from the packed slab (full-lane loads, value slices).
    # NOTE: not hoisted into persistent scratch: a pl.when(program_id==0) init
    # would never run on the second TensorCore under the "parallel" grid axis.
    w1 = p_ref[0:H, :][:, 0:S]                       # (24, 8)
    w2 = p_ref[H:2 * H, :][:, 0:H]                   # (24, 24)
    tail = p_ref[2 * H:3 * H, :]                     # (24, 128)
    w3 = tail[:, 0:1]                                # (24, 1)
    b1 = tail[:, 1:2]                                # (24, 1)
    b2 = tail[:, 2:3]                                # (24, 1)
    b3 = tail[0:1, 3:4]                              # (1, 1)

    # dense1 + relu  (MXU)
    h1 = jnp.maximum(
        jnp.dot(w1, xt, preferred_element_type=jnp.float32) + b1, 0.0)
    # dense2 + relu  (MXU)
    h2 = jnp.maximum(
        jnp.dot(w2, h1, preferred_element_type=jnp.float32) + b2, 0.0)
    # dense3 (24 -> 1): VPU multiply + XLU sublane reduce (no third MXU pass).
    out = jnp.sum(h2 * w3, axis=0, keepdims=True) + b3   # (1, TB), lane-dense

    o_ref[...] = out.astype(o_ref.dtype)


def pack_params(params):
    """Pack PyTorch-layout params into one (72, 128) f32 slab. Done once."""
    w1, b1, w2, b2, w3, b3 = params   # w: (out, in), b: (out,)
    H, S = HIDDEN_SPACE_SIZE, STATE_SPACE_SIZE
    slab = jnp.zeros((_SLAB_ROWS, _LANE), jnp.float32)
    slab = slab.at[0:H, 0:S].set(w1.astype(jnp.float32))
    slab = slab.at[H:2 * H, 0:H].set(w2.astype(jnp.float32))
    slab = slab.at[2 * H:3 * H, 0].set(w3.reshape(-1).astype(jnp.float32))
    slab = slab.at[2 * H:3 * H, 1].set(b1.astype(jnp.float32))
    slab = slab.at[2 * H:3 * H, 2].set(b2.astype(jnp.float32))
    slab = slab.at[2 * H, 3].set(jnp.asarray(b3, jnp.float32).reshape(()))
    return slab


def _pick_batch_tile(batch):
    """Largest tile <= 1024 lanes that keeps >= 2 (ideally even) grid blocks."""
    lanes = _round_up(max(batch, 1), _LANE)
    if lanes <= _LANE:
        return _LANE
    half = _round_up(_cdiv(lanes, 2), _LANE)   # two equal-ish blocks for v7x
    return min(_MAX_TILE, half)


def _vfa_call(xt, param_slab, batch_tile):
    """xt: (STATE, Bp) f32, Bp a multiple of batch_tile.  Returns (1, Bp) f32."""
    S, Bp = xt.shape
    H = HIDDEN_SPACE_SIZE
    n_blocks = Bp // batch_tile

    flops = 2 * Bp * (S * H + H * H + H)
    bytes_accessed = Bp * S * 4 + Bp * 4 + _SLAB_ROWS * _LANE * 4

    return pl.pallas_call(
        vfa_kernel,
        out_shape=jax.ShapeDtypeStruct((1, Bp), jnp.float32),
        grid=(n_blocks,),
        in_specs=[
            pl.BlockSpec((S, batch_tile), lambda i: (0, i)),
            pl.BlockSpec((_SLAB_ROWS, _LANE), lambda i: (0, 0)),  # resident slab
        ],
        out_specs=pl.BlockSpec((1, batch_tile), lambda i: (0, i)),
        compiler_params=pltpu.CompilerParams(
            dimension_semantics=("parallel",)),   # megacore shard on v7x
        cost_estimate=pl.CostEstimate(
            flops=flops, transcendentals=0, bytes_accessed=bytes_accessed),
    )(xt, param_slab)


@functools.partial(jax.jit, static_argnames=("batch_tile",))
def vfa_forward_feature_major(x_fm, param_slab, *, batch_tile=None):
    """Feature-major entry: x_fm (STATE, B) f32 -> (B,) values.

    Use this when the producer keeps activations feature-major: it avoids any
    wrapper-side transpose/pad HBM pass over the input.
    """
    S, B = x_fm.shape
    assert S == STATE_SPACE_SIZE, "expected (STATE_SPACE_SIZE, B) input"
    bt = _pick_batch_tile(B) if batch_tile is None else int(batch_tile)
    assert bt % _LANE == 0, "batch_tile must be a multiple of 128"

    Bp = _round_up(B, bt)
    xt = x_fm.astype(jnp.float32)
    if Bp != B:
        xt = jnp.pad(xt, ((0, 0), (0, Bp - B)))   # only when not tile-aligned

    out_row = _vfa_call(xt, param_slab, bt)       # (1, Bp), lane-dense
    return out_row[0, :B]                         # (B,)


@functools.partial(jax.jit, static_argnames=("batch_tile",))
def vfa_forward(x, param_slab, *, batch_tile=None):
    """Module-compatible entry: x (B, STATE_SPACE_SIZE) f32 -> (B, 1) f32.

    Does one wrapper-side transpose (an extra HBM pass over x); callers that
    can keep the batch feature-major should use vfa_forward_feature_major.
    """
    # TODO(synk): if the producing op can be fused (allow_input_fusion) or an
    # in-kernel (TB,8)->(8,TB) XLU transpose proves robust, drop this transpose.
    vals = vfa_forward_feature_major(x.T, param_slab, batch_tile=batch_tile)
    return vals[:, None]


def init_params(key):
    """nn.Linear-style init: W ~ U(+/-1/sqrt(fan_in)), shape (out, in); b (out,)."""
    def linear(k, fan_in, fan_out):
        kw, kb = jax.random.split(k)
        bound = 1.0 / jnp.sqrt(jnp.float32(fan_in))
        w = jax.random.uniform(kw, (fan_out, fan_in), jnp.float32, -bound, bound)
        b = jax.random.uniform(kb, (fan_out,), jnp.float32, -bound, bound)
        return w, b

    k1, k2, k3 = jax.random.split(key, 3)
    w1, b1 = linear(k1, STATE_SPACE_SIZE, HIDDEN_SPACE_SIZE)
    w2, b2 = linear(k2, HIDDEN_SPACE_SIZE, HIDDEN_SPACE_SIZE)
    w3, b3 = linear(k3, HIDDEN_SPACE_SIZE, 1)
    return (w1, b1, w2, b2, w3, b3)


if __name__ == "__main__":
    key = jax.random.PRNGKey(0)
    kp, kx, kx2 = jax.random.split(key, 3)

    params = init_params(kp)
    param_slab = pack_params(params)   # packed once; reused across calls

    # pure-JAX reference with PyTorch-layout weights (full f32 precision)
    w1, b1, w2, b2, w3, b3 = params
    hp = jax.lax.Precision.HIGHEST

    def ref_fwd(x):
        y = jnp.maximum(jnp.dot(x, w1.T, precision=hp) + b1, 0.0)
        y = jnp.maximum(jnp.dot(y, w2.T, precision=hp) + b2, 0.0)
        return jnp.dot(y, w3.T, precision=hp) + b3

    # 1) Module-shaped small batch: B=256 -> tile 128, 2 parallel blocks.
    B = 256
    x = jax.random.normal(kx, (B, STATE_SPACE_SIZE), jnp.float32)
    out = vfa_forward(x, param_slab)
    jax.block_until_ready(out)
    assert out.shape == (B, 1)
    assert jnp.allclose(out, ref_fwd(x), atol=1e-4, rtol=1e-4), \
        float(jnp.max(jnp.abs(out - ref_fwd(x))))

    # 2) Feature-major entry (no wrapper transpose), ragged batch: B=1000 ->
    #    tile 512, 2 parallel blocks, lane padding path exercised.
    B2 = 1000
    x2 = jax.random.normal(kx2, (B2, STATE_SPACE_SIZE), jnp.float32)
    out2 = vfa_forward_feature_major(x2.T, param_slab)   # upstream feature-major
    jax.block_until_ready(out2)
    assert out2.shape == (B2,)
    assert jnp.allclose(out2[:, None], ref_fwd(x2), atol=1e-4, rtol=1e-4), \
        float(jnp.max(jnp.abs(out2[:, None] - ref_fwd(x2))))

    print("KERNEL_OK")
</pallas_src>

<mosaic_0001>
module attributes {stable_mosaic.version = 11 : i64} {
  func.func @vfa_kernel(%arg0: i32, %arg1: memref<8x128xf32, #tpu.memory_space<vmem>>, %arg2: memref<72x128xf32, #tpu.memory_space<vmem>>, %arg3: memref<1x128xf32, #tpu.memory_space<vmem>>) attributes {dimension_semantics = [#tpu.dimension_semantics<parallel>], iteration_bounds = array<i64: 2>, scalar_prefetch = 0 : i64, scratch_operands = 0 : i64, tpu.core_type = #tpu.core_type<tc>, window_params = [{transform_indices = @transform_0, window_bounds = array<i64: 8, 128>}, {pipeline_mode = #tpu.pipeline_mode<synchronous>, transform_indices = @transform_1, window_bounds = array<i64: 72, 128>}, {transform_indices = @transform_2, window_bounds = array<i64: 1, 128>}]} {
    %c0 = arith.constant 0 : index
    %c0_0 = arith.constant 0 : index
    %0 = vector.load %arg1[%c0, %c0_0] : memref<8x128xf32, #tpu.memory_space<vmem>>, vector<8x128xf32>
    %c0_1 = arith.constant 0 : index
    %c0_2 = arith.constant 0 : index
    %1 = vector.load %arg2[%c0_1, %c0_2] : memref<72x128xf32, #tpu.memory_space<vmem>>, vector<24x128xf32>
    %2 = vector.extract_strided_slice %1 {offsets = [0, 0], sizes = [24, 8], strides = [1, 1]} : vector<24x128xf32> to vector<24x8xf32>
    %c24 = arith.constant 24 : index
    %c0_3 = arith.constant 0 : index
    %3 = vector.load %arg2[%c24, %c0_3] : memref<72x128xf32, #tpu.memory_space<vmem>>, vector<24x128xf32>
    %4 = vector.extract_strided_slice %3 {offsets = [0, 0], sizes = [24, 24], strides = [1, 1]} : vector<24x128xf32> to vector<24x24xf32>
    %c48 = arith.constant 48 : index
    %c0_4 = arith.constant 0 : index
    %5 = vector.load %arg2[%c48, %c0_4] : memref<72x128xf32, #tpu.memory_space<vmem>>, vector<24x128xf32>
    %6 = vector.extract_strided_slice %5 {offsets = [0, 0], sizes = [24, 1], strides = [1, 1]} : vector<24x128xf32> to vector<24x1xf32>
    %7 = vector.extract_strided_slice %5 {offsets = [0, 1], sizes = [24, 1], strides = [1, 1]} : vector<24x128xf32> to vector<24x1xf32>
    %8 = vector.extract_strided_slice %5 {offsets = [0, 2], sizes = [24, 1], strides = [1, 1]} : vector<24x128xf32> to vector<24x1xf32>
    %9 = vector.extract_strided_slice %5 {offsets = [0, 3], sizes = [1, 1], strides = [1, 1]} : vector<24x128xf32> to vector<1x1xf32>
    %cst = arith.constant dense<0.000000e+00> : vector<24x128xf32>
    %10 = tpu.matmul %2, %0, %cst {dimension_numbers = #tpu.dot_dimension_numbers<[1], [0], [0], [1], [0, 0, 1, 1], [], []>} : vector<24x8xf32>, vector<8x128xf32>, vector<24x128xf32> -> vector<24x128xf32>
    %11 = vector.broadcast %7 : vector<24x1xf32> to vector<24x128xf32>
    %12 = arith.addf %10, %11 : vector<24x128xf32>
    %cst_5 = arith.constant 0.000000e+00 : f32
    %13 = vector.broadcast %cst_5 : f32 to vector<24x128xf32>
    %14 = arith.maximumf %12, %13 : vector<24x128xf32>
    %cst_6 = arith.constant dense<0.000000e+00> : vector<24x128xf32>
    %15 = tpu.matmul %4, %14, %cst_6 {dimension_numbers = #tpu.dot_dimension_numbers<[1], [0], [0], [1], [0, 0, 1, 1], [], []>} : vector<24x24xf32>, vector<24x128xf32>, vector<24x128xf32> -> vector<24x128xf32>
    %16 = vector.broadcast %8 : vector<24x1xf32> to vector<24x128xf32>
    %17 = arith.addf %15, %16 : vector<24x128xf32>
    %cst_7 = arith.constant 0.000000e+00 : f32
    %18 = vector.broadcast %cst_7 : f32 to vector<24x128xf32>
    %19 = arith.maximumf %17, %18 : vector<24x128xf32>
    %20 = vector.broadcast %6 : vector<24x1xf32> to vector<24x128xf32>
    %21 = arith.mulf %19, %20 : vector<24x128xf32>
    %cst_8 = arith.constant dense<0.000000e+00> : vector<128xf32>
    %22 = vector.multi_reduction <add>, %21, %cst_8 [0] : vector<24x128xf32> to vector<128xf32>
    %23 = vector.shape_cast %22 : vector<128xf32> to vector<1x128xf32>
    %24 = vector.broadcast %9 : vector<1x1xf32> to vector<1x128xf32>
    %25 = arith.addf %23, %24 : vector<1x128xf32>
    %c0_9 = arith.constant 0 : index
    %c0_10 = arith.constant 0 : index
    %26 = vector.load %arg3[%c0_9, %c0_10] : memref<1x128xf32, #tpu.memory_space<vmem>>, vector<1x128xf32>
    tpu.vector_store %arg3[%c0_9, %c0_10], %25 {strides = array<i32>} : memref<1x128xf32, #tpu.memory_space<vmem>>, vector<1x128xf32>,
    return
  }
  func.func @transform_0(%arg0: i32) -> (i32, i32) {
    %c0_i32 = arith.constant 0 : i32
    %c0_i32_0 = arith.constant 0 : i32
    return %c0_i32, %arg0 : i32, i32
  }
  func.func @transform_1(%arg0: i32) -> (i32, i32) {
    %c0_i32 = arith.constant 0 : i32
    %c0_i32_0 = arith.constant 0 : i32
    %c0_i32_1 = arith.constant 0 : i32
    return %c0_i32, %c0_i32_0 : i32, i32
  }
  func.func @transform_2(%arg0: i32) -> (i32, i32) {
    %c0_i32 = arith.constant 0 : i32
    %c0_i32_0 = arith.constant 0 : i32
    return %c0_i32, %arg0 : i32, i32
  }
}

</mosaic_0001>

<bundles_post_ra>
// kernel: vfa_forward_feature_major.1
= control target key start
LH: loop header
LB: loop body
LE: loop exit
PB: predicated region body
PF: predicated region fallthrough
CT: control target
= control target key end

     0   :  { %7 = vsyncpa [#allocation3], 0  ;;  %s797_s0 = inlined_call_operand.hbm [shape: f32[8,256], index: 0, kind: input, shape index: {}]   ;;  %s798_s1 = inlined_call_operand.hbm [shape: f32[72,128], index: 1, kind: input, shape index: {}]   ;;  %s799_s2 = inlined_call_operand.hbm [shape: f32[1,256], index: 2, kind: output, shape index: {}]  }
   0x1   :  { %9 = vsyncpa [#allocation3 + $0x1], 0 }
   0x2   :  { %10 = vsyncpa [#allocation6], 0 }
   0x3   :  { %11 = vsyncpa [#allocation4], 0 }
   0x4   :  { %13 = vsyncpa [#allocation4 + $0x1], 0  ;;  %s660_s9 = smov 0   ;;  %s662_s10 = smov 0  }
   0x5   :  { %s664_s11 = smov 0   ;;  %s666_s12 = smov 0  }
   0x6 LB: > { %s108_s15 = sshll.u32 %s798_s1, 4  ;;  %s684_s16 = sadd.s32 4294967295, %s636_s12   ;;  %s636_s12 = sphi %s666_s12, %s809_s12   ;;  %s632_s11 = sphi %s664_s11, %s808_s11   ;;  %s628_s10 = sphi %s662_s10, %s807_s10   ;;  %s624_s9 = sphi %s660_s9, %s806_s9   ;;  %s109_s15 = int_to_ptr.hbm [resolvable:$true] %s108_s15 }
   0x7   : > { %p411_p0 = scmp.ge.s32.totalorder %s636_s12, 1  ;;  %p40_p1 = scmp.eq.s32.totalorder %s684_s16, 0 }
   0x8   : > { %p97_p2 = scmp.lt.s32.totalorder %s636_s12, 3  ;;  %s638_s18 = smov [#allocation5]  }
   0x9   : > { %s110_s19 = sshll.u32 %s638_s18, 4  ;;  %s639_s20 = smov 128   ;;  %s111_s19 = int_to_ptr.vmem [resolvable:$true] %s110_s19 }
   0xa   : > { %p689_p3 = pnand %p411_p0, %p97_p2  ;;  %s640_s21 = smov 8  }
   0xb   : > { %s410_s22 = sadd.s32 4294967294, %s636_s12   ;;  %s700_s23 = sadd.s32 1, %s636_s12  }
   0xc   : > { %p442_p4 = pneg %p689_p3  ;;  %s26_s24 = sadd.s32 1, %s632_s11 }
   0xd   : > { %s23_s25 = ssub.s32 %s636_s12, %s700_s23  ;;  %p33_p7 = scmp.ne.s32.totalorder %s632_s11, %s628_s10 }
   0xe   : > { %p443_p6 = pnand %p442_p4, %p40_p1  ;;  %p24_p8 = scmp.eq.s32.totalorder %s23_s25, 0 }
   0xf   : > { %p34_p9 = scmp.eq.s32.totalorder %s636_s12, 0  ;;  %p39_p10 = scmp.ne.s32.totalorder %s628_s10, %s624_s9 }
  0x10   : > { %445 = dma.hbm_to_vmem [thread:$0]  (!%p443_p6), %s109_s15, 1152, %s111_s19, [#allocation6], %s639_s20, %s639_s20, %s640_s21  }
  0x11   : > { %p84_p11 = scmp.eq.s32.totalorder %s684_s16, 1  ;;  %p716_p12 = por %p40_p1, %p39_p10 }
  0x12   : > { %s712_s26 = scalar_select %p24_p8, %s632_s11, %s26_s24  }
  0x13   : > { %p720_p13 = por %p84_p11, %p33_p7  ;;  %p90_p0 = scmp.eq.s32.totalorder %s410_s22, 1 }
  0x14   : > { %p35_p2 = por %p34_p9, %p33_p7  ;;  %s124_s29 = sand.u32 1, %s632_s11  }
  0x15   : > { %p725_p4 = por %p90_p0, %p39_p10  ;;  %p455_p6 = scmp.lt.s32.totalorder %s636_s12, 2 }
  0x16   : > { %s414_s3 = sshll.u32 %s124_s29, 3  ;;  %s415_s4 = sshll.u32 %s636_s12, 3 }
  0x17   : > { %s132_s7 = scalar_lea.hbm %s797_s0, %s415_s4  ;;  %s128_s13 = scalar_lea.vmem [#allocation2], %s414_s3 }
  0x18   : > { %s134_s8 = sshll.u32 %s132_s7, 4  ;;  %s136_s14 = sshll.u32 %s128_s13, 4  ;;  %s135_s8 = int_to_ptr.hbm [resolvable:$true] %s134_s8  ;;  %s137_s14 = int_to_ptr.vmem [resolvable:$true] %s136_s14 }
  0x19   : > { %p734_p8 = pnand %p455_p6, %p35_p2  ;;  %s125_s18 = scalar_lea.sflag [#allocation3], %s124_s29 }
  0x1a   : > { %s536_s19 = sshra.s32 %s135_s8, 4  ;;  %s543_s24 = scalar_lea.hbm %s797_s0, 16  ;;  %s537_s19 = int_to_ptr.hbm [resolvable:$true] %s536_s19 }
  0x1b   : > { %s538_s20 = scalar_lea.hbm %s537_s19, 8  ;;  %p540_p9 = pneg %p734_p8 }
  0x1c   : > { %p539_p7 = scmp.ne.s32.totalorder %s537_s19, %s538_s20  ;;  %p544_p0 = scmp.lt.s32.totalorder %s537_s19, %s797_s0 }
  0x1d   : > { %p545_p2 = scmp.lt.s32.totalorder %s543_s24, %s538_s20 }
  0x1e   : > { %p541_p10 = pnand %p540_p9, %p539_p7 }
  0x1f   : > { %p546_p6 = por %p545_p2, %p544_p0 }
  0x20   : > { %p542_p11 = pneg %p541_p10 }
  0x22   : > { %p547_p5 = pnand %p546_p6, %p542_p11 }
  0x24   : > { %550 = shalt.err (!%p547_p5)
}
  0x25   : > { %449 = dma.hbm_to_vmem [thread:$0]  (!%p734_p8), %s135_s8, 128, %s137_s14, %s125_s18  }
  0x26   : > { %145 = sbr.rel (%p689_p3) target bundleno = 356 (0x164), region = 28  ;;  %s751_s29 = sand.u32 (!%p689_p3), 1, %s628_s10  }
  0x27   : > { %s417_s4 = sshll.u32 (!%p689_p3), %s751_s29, 3  ;;  %s148_s5 = scalar_lea.sflag (!%p689_p3), [#allocation3], %s751_s29 }
  0x28   : > { %s151_s6 = scalar_lea.vmem (!%p689_p3), [#allocation2], %s417_s4 }
  0x2b   : > { %611 = dma.done.wait (%p716_p12), %s148_s5, 128  }
  0x2c   : > { %613 = vsyncadd (%p716_p12), %s148_s5, 4294967168 }
  0x2d   : > { %615 = dma.done.wait (%p40_p1), [#allocation6], 1152  }
  0x2e   : > { %617 = vsyncadd (%p40_p1), [#allocation6], 4294966144  ;;  %v641_v0 = vmov 1   ;;  %vm202_vm0 = vcmask 64512   ;;  %v177_v1 = vld [vmem:[%s151_s6] sm:$0xff]  ;;  %v179_v2 = vld [vmem:[#allocation5 + $0x8] sm:$0xff]  ;;  %s330_s7 = scalar_lea.hbm %s799_s2, %s684_s16 }
  0x2f   : > { %497 = vset.pattern.permute.xlu0 %v641_v0  ;;  %498 = vset.pattern.permute.xlu1 %v641_v0  ;;  %v186_v3 = vld [vmem:[#allocation5 + $0x40] sm:$0xff]  ;;  %v184_v5 = vld [vmem:[#allocation5 + $0x30] sm:$0xff]  ;;  %v185_v7 = vld [vmem:[#allocation5 + $0x38] sm:$0xff]  ;;  %v642_v8 = vmov 2   ;;  %v643_v9 = vmov 0   ;;  %v644_v11 = vmov 3  }
  0x30   : > { %427 = vmatpush.msra.mxu3 %v177_v1  ;;  %227 = vmatpush.msra.mxu0 %v177_v1  ;;  %v178_v4 = vld [vmem:[#allocation5] sm:$0xff]  ;;  %v180_v6 = vld [vmem:[#allocation5 + $0x10] sm:$0xff]  ;;  %v181_v23 = vld [vmem:[#allocation5 + $0x18] sm:$0xff]  ;;  %vm253_vm1 = vcmask 195584   ;;  %s176_s8 = scalar_lea.vmem [#allocation7], %s751_s29  ;;  %s334_s14 = sshll.u32 %s330_s7, 4  ;;  %s335_s14 = int_to_ptr.hbm [resolvable:$true] %s334_s14 }
  0x31   : > { %420 = vmatmul.msk.f32.vlgmr.msra.gmra.mxu3 %vm202_vm0, %v179_v2  ;;  %199 = vperm.xlu0 %497, %v186_v3   ;;  %v182_v24 = vld [vmem:[#allocation5 + $0x20] sm:$0xff]  ;;  %v183_v25 = vld [vmem:[#allocation5 + $0x28] sm:$0xff]  ;;  %s332_s13 = sshll.u32 %s176_s8, 4  ;;  %s322_s15 = scalar_lea.sflag [#allocation4], %s751_s29  ;;  %s333_s13 = int_to_ptr.vmem [resolvable:$true] %s332_s13 }
  0x32   : > { %419 = vmatmul.msk.f32.vlgmr.msra.gmra.mxu0 %vm202_vm0, %v178_v4  ;;  %189 = vperm.xlu1 %498, %v184_v5   ;;  %s580_s18 = sshra.s32 %s335_s14, 4  ;;  %s586_s21 = scalar_lea.hbm %s799_s2, 2  ;;  %s581_s18 = int_to_ptr.hbm [resolvable:$true] %s580_s18 }
  0x33   : > { %500 = vset.pattern.permute.xlu2 %v642_v8  ;;  %s582_s19 = scalar_lea.hbm %s581_s18, 1  ;;  %p587_p12 = scmp.lt.s32.totalorder %s581_s18, %s799_s2 }
  0x34   : > { %246 = vperm.xlu2 %500, %v185_v7   ;;  %p583_p1 = scmp.ne.s32.totalorder %s581_s18, %s582_s19  ;;  %p588_p8 = scmp.lt.s32.totalorder %s586_s21, %s582_s19 }
  0x36   : > { %p584_p3 = pnand %p583_p1, %p720_p13  ;;  %p589_p7 = por %p588_p8, %p587_p12 }
  0x38   : > { %p585_p5 = pneg %p584_p3 }
  0x39   : > { %421 = vmatmul.msk.f32.gmra.mxu3 %vm202_vm0, %v180_v6  ;;  %194 = vperm.xlu0 %497, %v185_v7  }
  0x3a   : > { %499 = vset.pattern.permute.xlu1 %v642_v8  ;;  %p590_p9 = pnand %p589_p7, %p585_p5 }
  0x3b   : > { %242 = vperm.xlu1 %499, %v184_v5  }
  0x3c   : > { %250 = vperm.xlu2 %500, %v186_v3  }
  0x41   : > { %501 = vset.pattern.permute.xlu0 %v643_v9 }
  0x42   : > { %293 = vperm.xlu0 %501, %v184_v5  }
  0x43   : > { %502 = vset.pattern.permute.xlu1 %v643_v9 }
  0x44   : > { %297 = vperm.xlu1 %502, %v185_v7   ;;  %503 = vset.pattern.permute.xlu2 %v643_v9 }
  0x45   : > { %301 = vperm.xlu2 %503, %v186_v3  }
  0x4a   : > { %505 = vset.pattern.permute.xlu0 %v644_v11 }
  0x4c   : > { %504 = vset.pattern.permute.xlu1 %v644_v11 }
  0x4d   : > { %316 = vperm.xlu1 %504, %v184_v5  }
  0x8e   : > { %v247_v26 = vpop.permute.xlu2 %246 }
  0x96   : > { %v251_v29 = vpop.permute.xlu2 %250 }
  0x9f   : > { %v302_v41 = vpop.permute.xlu2 %301 }
  0xa3   : > { %v200_v10 = vpop.permute.xlu0 %199 }
  0xa4   : > { %v190_v13 = vpop.permute.xlu1 %189 }
  0xab   : > { %v195_v14 = vpop.permute.xlu0 %194 }
  0xad   : > { %v243_v27 = vpop.permute.xlu1 %242 }
  0xaf   : > { %v229_v15 = vpop.f32.mrf.mxu0 }
  0xb0   : > { %v230_v19 = vadd.f32 %v229_v15, %v190_v13 }
  0xb2   : > { %v238_v22 = vmax.f32 %v230_v19, 0.0 }
  0xb4   : > { %v232_v12 = vpop.f32.mrf.mxu3  ;;  %v294_v35 = vpop.permute.xlu0 %293 }
  0xb5   : > { %v233_v17 = vadd.f32 %v232_v12, %v195_v14 }
  0xb6   : > { %v298_v36 = vpop.permute.xlu1 %297 }
  0xb7   : > { %v239_v21 = vmax.f32 %v233_v17, 0.0 }
  0xbc   : > { %v235_v16 = vpop.f32.mrf.mxu3 }
  0xbd   : > { %v236_v18 = vadd.f32 %v235_v16, %v200_v10 }
  0xbf   : > { %v240_v20 = vmax.f32 %v236_v18, 0.0  ;;  %v317_v51 = vpop.permute.xlu1 %316 }
  0xc1   : > { %276 = vmatpush.msrb.mxu0 %v240_v20  ;;  %428 = vmatpush.msra.mxu1 %v240_v20 }
  0xc2   : > { %429 = vmatpush.msra.mxu2 %v240_v20 }
  0xc3   : > { %277 = vmatpush.msrb.mxu0 %v239_v21  ;;  %430 = vmatpush.msra.mxu1 %v239_v21 }
  0xc4   : > { %431 = vmatpush.msra.mxu2 %v239_v21 }
  0xc5   : > { %278 = vmatpush.msrb.mxu0 %v238_v22  ;;  %432 = vmatpush.msra.mxu1 %v238_v22 }
  0xc6   : > { %433 = vmatpush.msra.mxu2 %v238_v22  ;;  %422 = vmatmul.msk.f32.vlgmr.msrb.gmra.mxu0 %vm253_vm1, %v181_v23 }
  0xc7   : > { %423 = vmatmul.msk.f32.vlgmr.msra.gmra.mxu1 %vm253_vm1, %v182_v24  ;;  %424 = vmatmul.msk.f32.vlgmr.msra.gmra.mxu2 %vm253_vm1, %v183_v25 }
 0x143   : > { %v280_v28 = vpop.f32.mrf.mxu0 }
 0x144   : > { %v281_v30 = vadd.f32 %v280_v28, %v243_v27  ;;  %v283_v31 = vpop.f32.mrf.mxu1 }
 0x145   : > { %v284_v32 = vadd.f32 %v283_v31, %v247_v26 }
 0x146   : > { %v289_v33 = vmax.f32 %v281_v30, 0.0 }
 0x147   : > { %v290_v34 = vmax.f32 %v284_v32, 0.0 }
 0x148   : > { %v304_v38 = vmul.f32 %v294_v35, %v289_v33 }
 0x149   : > { %v305_v39 = vmul.f32 %v298_v36, %v290_v34 }
 0x14a   : > { %v286_v37 = vpop.f32.mrf.mxu2 }
 0x14b   : > { %v287_v40 = vadd.f32 %v286_v37, %v251_v29  ;;  %v307_v43 = vadd.f32 %v305_v39, %v304_v38 }
 0x14d   : > { %v291_v42 = vmax.f32 %v287_v40, 0.0 }
 0x14f   : > { %v306_v44 = vmul.f32 %v302_v41, %v291_v42 }
 0x151   : > { %v308_v45 = vadd.f32 %v307_v43, %v306_v44 }
 0x153   : > { %v309_v46 = vrot.slane %v308_v45, 4 }
 0x155   : > { %v310_v47 = vadd.f32 %v309_v46, %v308_v45 }
 0x157   : > { %v311_v48 = vrot.slane %v310_v47, 2 }
 0x159   : > { %v312_v49 = vadd.f32 %v311_v48, %v310_v47 }
 0x15b   : > { %v313_v50 = vrot.slane %v312_v49, 1 }
 0x15d   : > { %v314_v52 = vadd.f32 %v313_v50, %v312_v49 }
 0x15f   : > { %v319_v53 = vadd.f32 %v317_v51, %v314_v52 }
 0x161   : > { %320 = vst [vmem:[%s176_s8] sm:$0x1] %v319_v53 }
 0x162   : > { %593 = shalt.err (!%p590_p9)
}
 0x163   : > { %440 = dma.vmem_to_hbm [thread:$0]  (%p720_p13), %s333_s13, 16, %s335_s14, %s322_s15  }
 0x164 PF: > { %s346_s25 = sand.u32 1, %s624_s9   ;;  %p805_p10 = scmp.ge.s32.totalorder %s636_s12, 2 }
 0x165   : > { %s347_s3 = scalar_lea.sflag [#allocation4], %s346_s25 }
 0x166   : > { %p451_p11 = pnand %p805_p10, %p725_p4 }
 0x168   : > { %p452_p0 = pneg %p451_p11 }
 0x16a   : > { %619 = dma.done.wait (%p452_p0), %s347_s3, 16  }
 0x16b   : > { %621 = vsyncadd (%p452_p0), %s347_s3, 4294967280  ;;  %p16_p2 = scmp.ge.s32.totalorder %s700_s23, 4   ;;  %s806_s9 = smov %s628_s10 }
 0x16c   : > { %s807_s10 = smov %s632_s11  ;;  %s808_s11 = smov %s712_s26 }
 0x16d   : > { %s809_s12 = smov %s700_s23  ;;  %18 = sbr.rel (!%p16_p2) target bundleno = 6 (0x6), region = 77 }
 0x172   :  { %352 = vsyncpa [#allocation3], 1 }
 0x173   :  { %354 = vsyncpa [#allocation3 + $0x1], 1 }
 0x174   :  { %355 = vsyncpa [#allocation6], 1 }
 0x175   :  { %356 = vsyncpa [#allocation4], 1 }
 0x176   :  { %358 = vsyncpa [#allocation4 + $0x1], 1 }

</bundles_post_ra>
